<compile_context>
chip_gen: v7x
topology: tpu7x:2x2x1
jax: 0.10.0
libtpu: 0.0.40
codegen_flags: <defaults>
</compile_context>

<pallas_src>
import math

import jax
import jax.numpy as jnp
from jax.experimental import pallas as pl
from jax.experimental.pallas import tpu as pltpu


def _fusion_gate_kernel(x1_ref, x2_ref, wa_ref, wb_ref, bd_ref, o_ref):
    """One (1, R, TS) tile; R = nb*C rows on sublanes, TS voxels on lanes.

    d   = w2 - w1 = Wa_blk @ x1 + Wb_blk @ x2 + bd    (block-diag 1x1x1 conv)
    g1  = 1 / (1 + exp(d))  ==  exp(w1) / (exp(w1) + exp(w2))
    out = x2 + (x1 - x2) * g1
    """
    x1 = x1_ref[0].astype(jnp.float32)                     # (R, TS)
    x2 = x2_ref[0].astype(jnp.float32)                     # (R, TS)

    # Tiny (R,R)x(R,TS) contraction on the MXU (otherwise-idle slot); default
    # precision — a gating logit feeding a sigmoid does not need HIGHEST.
    d = (jnp.dot(wa_ref[...], x1, preferred_element_type=jnp.float32)
         + jnp.dot(wb_ref[...], x2, preferred_element_type=jnp.float32)
         + bd_ref[...])

    # Clamp so exp() never overflows to inf (g1 -> 0 there anyway), then one
    # EUP exp + one EUP approx reciprocal; short VALU blend.
    d = jnp.minimum(d, 80.0)
    g1 = pl.reciprocal(1.0 + jnp.exp(d), approx=True)      # == sigmoid(-d)
    o_ref[0] = (x2 + (x1 - x2) * g1).astype(o_ref.dtype)


def _pick_batch_fold(n, c, itemsize):
    """Smallest nb dividing N such that nb*C fills the sublane dimension."""
    sub = 8 if itemsize >= 4 else 16           # f32 vreg: 8 sublanes, bf16: 16
    if c % sub == 0:
        return 1
    nb = sub // math.gcd(c, sub)               # smallest nb with nb*C % sub == 0
    if nb > 1 and n % nb == 0 and nb * c <= 512:
        return nb
    return 1


def fusion_gate_pallas(x1, x2, conv1_w, conv1_b, conv2_w, conv2_b,
                       *, step_bytes_target=6 << 20):
    """x1, x2: (N, C, D, H, W); conv*_w: (C, 2C, 1, 1, 1); conv*_b: (C,)."""
    N, C, D, H, W = x1.shape
    S = D * H * W
    itemsize = jnp.dtype(x1.dtype).itemsize

    # ---- fold batch samples onto the sublane axis: (N, C, S) -> (G, R, S) ----
    nb = _pick_batch_fold(N, C, itemsize)
    G, R = N // nb, nb * C
    x1_s = x1.reshape(G, R, S)                 # contiguous views, no HBM pass
    x2_s = x2.reshape(G, R, S)

    # ---- gate depends only on w2 - w1: one difference conv, block-diag ------
    w1 = conv1_w.reshape(C, 2 * C).astype(jnp.float32)
    w2 = conv2_w.reshape(C, 2 * C).astype(jnp.float32)
    wd = w2 - w1
    eye = jnp.eye(nb, dtype=jnp.float32)
    wa_blk = jnp.kron(eye, wd[:, :C])          # (R, R), acts on x1
    wb_blk = jnp.kron(eye, wd[:, C:])          # (R, R), acts on x2
    bd_blk = jnp.tile((conv2_b.astype(jnp.float32)
                       - conv1_b.astype(jnp.float32)).reshape(C, 1), (nb, 1))

    # ---- spatial tile: lane-dense (multiple of 128) and sized so each grid
    # step moves ~step_bytes_target of HBM traffic (x1 + x2 + out). -----------
    ts = max(128, (step_bytes_target // (3 * R * itemsize)) // 128 * 128)
    if ts >= S:
        ts = S                                 # single full-extent block
    # Megacore (v7x): avoid a 1-step grid when the spatial axis can be split.
    if G * pl.cdiv(S, ts) < 2 and S >= 256:
        ts = max(128, (-(-S // 2) + 127) // 128 * 128)
    grid_s = pl.cdiv(S, ts)                    # ragged tail = masked partial block

    # ---- VMEM: 3 double-buffered (R, ts) blocks + resident weights ----------
    vmem_need = (3 * 2 * R * ts * itemsize) + 2 * (2 * R * R + R) * 4 + (2 << 20)
    vmem_limit_bytes = int(min(40 << 20, max(16 << 20, vmem_need)))

    x_spec = pl.BlockSpec((1, R, ts), lambda g, s: (g, 0, s))
    w_spec = pl.BlockSpec((R, R), lambda g, s: (0, 0))
    b_spec = pl.BlockSpec((R, 1), lambda g, s: (0, 0))

    out = pl.pallas_call(
        _fusion_gate_kernel,
        out_shape=jax.ShapeDtypeStruct((G, R, S), x1.dtype),
        grid_spec=pltpu.PrefetchScalarGridSpec(
            num_scalar_prefetch=0,
            grid=(G, grid_s),
            in_specs=[x_spec, x_spec, w_spec, w_spec, b_spec],
            out_specs=x_spec,
        ),
        compiler_params=pltpu.CompilerParams(
            dimension_semantics=("parallel", "parallel"),
            vmem_limit_bytes=vmem_limit_bytes),
    )(x1_s, x2_s, wa_blk, wb_blk, bd_blk)

    return out.reshape(N, C, D, H, W)


def fusion_gate_ref(x1, x2, conv1_w, conv1_b, conv2_w, conv2_b):
    """Pure-JAX reference mirroring the PyTorch forward (NCDHW), exact f32."""
    C = conv1_w.shape[0]
    hp = jax.lax.Precision.HIGHEST
    x = jnp.concatenate([x1, x2], axis=1)                  # (N, 2C, D, H, W)
    wm1 = conv1_w.reshape(C, 2 * C)
    wm2 = conv2_w.reshape(C, 2 * C)
    w1 = jnp.einsum('ncdhw,oc->nodhw', x, wm1, precision=hp) \
        + conv1_b[None, :, None, None, None]
    w2 = jnp.einsum('ncdhw,oc->nodhw', x, wm2, precision=hp) \
        + conv2_b[None, :, None, None, None]
    e1, e2 = jnp.exp(w1), jnp.exp(w2)
    return x1 * (e1 / (e1 + e2)) + x2 * (e2 / (e1 + e2))


if __name__ == "__main__":
    key = jax.random.PRNGKey(0)
    k1, k2, kb1, kb2, kw1, kw2 = jax.random.split(key, 6)

    # Small shapes: N=2, channel_num=4, D=4, H=8, W=8  -> S = 256 voxels/sample.
    N, C, D, H, W = 2, 4, 4, 8, 8
    x1 = jax.random.normal(k1, (N, C, D, H, W), dtype=jnp.float32)
    x2 = jax.random.normal(k2, (N, C, D, H, W), dtype=jnp.float32)

    fan_in = 2 * C
    bound = 1.0 / jnp.sqrt(jnp.float32(fan_in))
    conv1_b = jax.random.uniform(kb1, (C,), jnp.float32, -bound, bound)
    conv2_b = jax.random.uniform(kb2, (C,), jnp.float32, -bound, bound)

    # Tolerance note (per perf review): default-precision MXU dot + approx
    # reciprocal give ~1e-3-level relative error in the gate; that is fine for
    # a sigmoid gate, so the self-check uses a correspondingly looser bound.
    TOL = dict(atol=2e-2, rtol=2e-2)

    # Case 1: module default init (zero conv weights, random biases).
    zw1 = jnp.zeros((C, 2 * C, 1, 1, 1), dtype=jnp.float32)
    zw2 = jnp.zeros((C, 2 * C, 1, 1, 1), dtype=jnp.float32)
    out0 = jax.block_until_ready(
        fusion_gate_pallas(x1, x2, zw1, conv1_b, zw2, conv2_b))
    ref0 = fusion_gate_ref(x1, x2, zw1, conv1_b, zw2, conv2_b)
    assert out0.shape == (N, C, D, H, W)
    assert jnp.allclose(out0, ref0, **TOL), "mismatch (zero weights)"

    # Case 2: nonzero random weights so the channel-mixing path is exercised.
    conv1_w = jax.random.uniform(kw1, (C, 2 * C, 1, 1, 1), jnp.float32, -bound, bound)
    conv2_w = jax.random.uniform(kw2, (C, 2 * C, 1, 1, 1), jnp.float32, -bound, bound)
    out1 = jax.block_until_ready(
        fusion_gate_pallas(x1, x2, conv1_w, conv1_b, conv2_w, conv2_b))
    ref1 = fusion_gate_ref(x1, x2, conv1_w, conv1_b, conv2_w, conv2_b)
    assert out1.shape == (N, C, D, H, W)
    assert jnp.allclose(out1, ref1, **TOL), "mismatch (random weights)"

    print("KERNEL_OK")
</pallas_src>

<mosaic_0001>
module attributes {stable_mosaic.version = 11 : i64} {
  func.func @_fusion_gate_kernel(%arg0: i32, %arg1: i32, %arg2: memref<1x8x128xf32, #tpu.memory_space<vmem>>, %arg3: memref<1x8x128xf32, #tpu.memory_space<vmem>>, %arg4: memref<8x8xf32, #tpu.memory_space<vmem>>, %arg5: memref<8x8xf32, #tpu.memory_space<vmem>>, %arg6: memref<8x1xf32, #tpu.memory_space<vmem>>, %arg7: memref<1x8x128xf32, #tpu.memory_space<vmem>>) attributes {dimension_semantics = [#tpu.dimension_semantics<parallel>, #tpu.dimension_semantics<parallel>], iteration_bounds = array<i64: 1, 2>, scalar_prefetch = 0 : i64, scratch_operands = 0 : i64, tpu.core_type = #tpu.core_type<tc>, window_params = [{transform_indices = @transform_0, window_bounds = array<i64: 1, 8, 128>}, {transform_indices = @transform_1, window_bounds = array<i64: 1, 8, 128>}, {pipeline_mode = #tpu.pipeline_mode<synchronous>, transform_indices = @transform_2, window_bounds = array<i64: 8, 8>}, {pipeline_mode = #tpu.pipeline_mode<synchronous>, transform_indices = @transform_3, window_bounds = array<i64: 8, 8>}, {pipeline_mode = #tpu.pipeline_mode<synchronous>, transform_indices = @transform_4, window_bounds = array<i64: 8, 1>}, {transform_indices = @transform_5, window_bounds = array<i64: 1, 8, 128>}]} {
    %c0 = arith.constant 0 : index
    %c0_0 = arith.constant 0 : index
    %c0_1 = arith.constant 0 : index
    %0 = vector.load %arg2[%c0, %c0_0, %c0_1] : memref<1x8x128xf32, #tpu.memory_space<vmem>>, vector<1x8x128xf32>
    %1 = vector.shape_cast %0 : vector<1x8x128xf32> to vector<8x128xf32>
    %c0_2 = arith.constant 0 : index
    %c0_3 = arith.constant 0 : index
    %c0_4 = arith.constant 0 : index
    %2 = vector.load %arg3[%c0_2, %c0_3, %c0_4] : memref<1x8x128xf32, #tpu.memory_space<vmem>>, vector<1x8x128xf32>
    %3 = vector.shape_cast %2 : vector<1x8x128xf32> to vector<8x128xf32>
    %c0_5 = arith.constant 0 : index
    %c0_6 = arith.constant 0 : index
    %4 = vector.load %arg4[%c0_5, %c0_6] : memref<8x8xf32, #tpu.memory_space<vmem>>, vector<8x8xf32>
    %cst = arith.constant dense<0.000000e+00> : vector<8x128xf32>
    %5 = tpu.matmul %4, %1, %cst {dimension_numbers = #tpu.dot_dimension_numbers<[1], [0], [0], [1], [0, 0, 1, 1], [], []>} : vector<8x8xf32>, vector<8x128xf32>, vector<8x128xf32> -> vector<8x128xf32>
    %c0_7 = arith.constant 0 : index
    %c0_8 = arith.constant 0 : index
    %6 = vector.load %arg5[%c0_7, %c0_8] : memref<8x8xf32, #tpu.memory_space<vmem>>, vector<8x8xf32>
    %cst_9 = arith.constant dense<0.000000e+00> : vector<8x128xf32>
    %7 = tpu.matmul %6, %3, %cst_9 {dimension_numbers = #tpu.dot_dimension_numbers<[1], [0], [0], [1], [0, 0, 1, 1], [], []>} : vector<8x8xf32>, vector<8x128xf32>, vector<8x128xf32> -> vector<8x128xf32>
    %8 = arith.addf %5, %7 : vector<8x128xf32>
    %c0_10 = arith.constant 0 : index
    %c0_11 = arith.constant 0 : index
    %9 = vector.load %arg6[%c0_10, %c0_11] : memref<8x1xf32, #tpu.memory_space<vmem>>, vector<8x1xf32>
    %10 = vector.broadcast %9 : vector<8x1xf32> to vector<8x128xf32>
    %11 = arith.addf %8, %10 : vector<8x128xf32>
    %cst_12 = arith.constant 8.000000e+01 : f32
    %12 = vector.broadcast %cst_12 : f32 to vector<8x128xf32>
    %13 = arith.minimumf %11, %12 : vector<8x128xf32>
    %14 = math.exp %13 : vector<8x128xf32>
    %cst_13 = arith.constant 1.000000e+00 : f32
    %15 = vector.broadcast %cst_13 : f32 to vector<8x128xf32>
    %16 = arith.addf %15, %14 : vector<8x128xf32>
    %17 = tpu.reciprocal %16 {approx = true} : vector<8x128xf32> -> vector<8x128xf32>
    %18 = arith.subf %1, %3 : vector<8x128xf32>
    %19 = arith.mulf %18, %17 : vector<8x128xf32>
    %20 = arith.addf %3, %19 : vector<8x128xf32>
    %c0_14 = arith.constant 0 : index
    %c0_15 = arith.constant 0 : index
    %c0_16 = arith.constant 0 : index
    %21 = vector.load %arg7[%c0_14, %c0_15, %c0_16] : memref<1x8x128xf32, #tpu.memory_space<vmem>>, vector<1x8x128xf32>
    %22 = vector.shape_cast %21 : vector<1x8x128xf32> to vector<8x128xf32>
    %23 = vector.shape_cast %20 : vector<8x128xf32> to vector<1x8x128xf32>
    tpu.vector_store %arg7[%c0_14, %c0_15, %c0_16], %23 {strides = array<i32>} : memref<1x8x128xf32, #tpu.memory_space<vmem>>, vector<1x8x128xf32>,
    return
  }
  func.func @transform_0(%arg0: i32, %arg1: i32) -> (i32, i32, i32) {
    %c0_i32 = arith.constant 0 : i32
    %c0_i32_0 = arith.constant 0 : i32
    return %arg0, %c0_i32, %arg1 : i32, i32, i32
  }
  func.func @transform_1(%arg0: i32, %arg1: i32) -> (i32, i32, i32) {
    %c0_i32 = arith.constant 0 : i32
    %c0_i32_0 = arith.constant 0 : i32
    return %arg0, %c0_i32, %arg1 : i32, i32, i32
  }
  func.func @transform_2(%arg0: i32, %arg1: i32) -> (i32, i32) {
    %c0_i32 = arith.constant 0 : i32
    %c0_i32_0 = arith.constant 0 : i32
    %c0_i32_1 = arith.constant 0 : i32
    return %c0_i32, %c0_i32_0 : i32, i32
  }
  func.func @transform_3(%arg0: i32, %arg1: i32) -> (i32, i32) {
    %c0_i32 = arith.constant 0 : i32
    %c0_i32_0 = arith.constant 0 : i32
    %c0_i32_1 = arith.constant 0 : i32
    return %c0_i32, %c0_i32_0 : i32, i32
  }
  func.func @transform_4(%arg0: i32, %arg1: i32) -> (i32, i32) {
    %c0_i32 = arith.constant 0 : i32
    %c0_i32_0 = arith.constant 0 : i32
    %c0_i32_1 = arith.constant 0 : i32
    return %c0_i32, %c0_i32_0 : i32, i32
  }
  func.func @transform_5(%arg0: i32, %arg1: i32) -> (i32, i32, i32) {
    %c0_i32 = arith.constant 0 : i32
    %c0_i32_0 = arith.constant 0 : i32
    return %arg0, %c0_i32, %arg1 : i32, i32, i32
  }
}

</mosaic_0001>

<bundles_post_ra>
// kernel: tpu_custom_call.1
= control target key start
LH: loop header
LB: loop body
LE: loop exit
PB: predicated region body
PF: predicated region fallthrough
CT: control target
= control target key end

     0   :  { %10 = vsyncpa [#allocation3], 0  ;;  %s1114_s0 = inlined_call_operand.hbm [shape: f32[1,8,256], index: 0, kind: input, shape index: {}]   ;;  %s1115_s1 = inlined_call_operand.hbm [shape: f32[1,8,256], index: 1, kind: input, shape index: {}]   ;;  %s1116_s2 = inlined_call_operand.vmem [shape: f32[8,8], index: 2, kind: input, shape index: {}]   ;;  %s1117_s3 = inlined_call_operand.vmem [shape: f32[8,8], index: 3, kind: input, shape index: {}]   ;;  %s1118_s4 = inlined_call_operand.vmem [shape: f32[8,1], index: 4, kind: input, shape index: {}]   ;;  %s1119_s5 = inlined_call_operand.hbm [shape: f32[1,8,256], index: 5, kind: output, shape index: {}]  }
   0x1   :  { %12 = vsyncpa [#allocation3 + $0x1], 0 }
   0x2   :  { %13 = vsyncpa [#allocation6], 0 }
   0x3   :  { %15 = vsyncpa [#allocation6 + $0x1], 0 }
   0x4   :  { %16 = vsyncpa [#allocation4], 0 }
   0x5   :  { %18 = vsyncpa [#allocation4 + $0x1], 0  ;;  %s880_s18 = smov 0   ;;  %s882_s19 = smov 0  }
   0x6   :  { %s884_s20 = smov 0   ;;  %s886_s21 = smov 0  }
   0x7   :  { %s888_s22 = smov 0   ;;  %s890_s23 = smov 0  }
   0x8 LB: > { %s589_s24 = sadd.s32 4294967295, %s842_s23   ;;  %s590_s25 = sadd.s32 4294967294, %s842_s23   ;;  %s842_s23 = sphi %s890_s23, %s24_s23   ;;  %s838_s22 = sphi %s888_s22, %s1139_s22   ;;  %s834_s21 = sphi %s886_s21, %s1138_s21   ;;  %s830_s20 = sphi %s884_s20, %s1137_s20   ;;  %s826_s19 = sphi %s882_s19, %s1136_s19   ;;  %s822_s18 = sphi %s880_s18, %s1135_s18  }
   0x9   : > { %s33_s26 = sadd.s32 1, %s838_s22  ;;  %s45_s27 = sadd.s32 1, %s830_s20 }
   0xa   : > { %p34_p0 = scmp.ge.s32.totalorder %s33_s26, 2  ;;  %p52_p1 = scmp.ne.s32.totalorder %s830_s20, %s826_s19 }
   0xb   : > { %p53_p2 = scmp.eq.s32.totalorder %s842_s23, 0  ;;  %p58_p3 = scmp.ne.s32.totalorder %s826_s19, %s822_s18 }
   0xc   : > { %s1141_s26 = smov (%p34_p0, %s33_s26), 0  ;;  %p59_p5 = scmp.eq.s32.totalorder %s589_s24, 0 }
   0xd   : > { %p921_p4 = por %p53_p2, %p52_p1  ;;  %s41_s29 = ssub.s32 %s838_s22, %s1141_s26 }
   0xe   : > { %p175_p6 = scmp.eq.s32.totalorder %s589_s24, 1  ;;  %p43_p7 = scmp.eq.s32.totalorder %s41_s29, 0 }
   0xf   : > { %p927_p8 = por %p59_p5, %p58_p3  ;;  %p181_p10 = scmp.eq.s32.totalorder %s590_s25, 1 }
  0x10   : > { %p931_p9 = por %p175_p6, %p52_p1  ;;  %p638_p13 = scmp.lt.s32.totalorder %s842_s23, 2 }
  0x11   : > { %s1123_s30 = scalar_select %p927_p8, 1, 0 }
  0x12   : > { %s1124_s6 = scalar_select %p931_p9, 1, 0 }
  0x13   : > { %s936_s7 = scalar_select %p43_p7, %s830_s20, %s45_s27  }
  0x14   : > { %p938_p11 = por %p181_p10, %p58_p3  ;;  %s945_s9 = sand.u32 1, %s830_s20  }
  0x15   : > { %s593_s10 = sshll.u32 %s945_s9, 3  ;;  %s594_s11 = sshll.u32 %s838_s22, 7 }
  0x16   : > { %s1125_s8 = scalar_select %p938_p11, 1, 0 }
  0x17   : > { %s954_s14 = scalar_lea.hbm %s1114_s0, %s594_s11  ;;  %s214_s15 = scalar_lea.vmem [#allocation2], %s593_s10 }
  0x18   : > { %s223_s16 = sshll.u32 %s214_s15, 4  ;;  %p962_p0 = pnand %p638_p13, %p921_p4  ;;  %s958_s16 = int_to_ptr.vmem [resolvable:$true] %s223_s16 }
  0x19   : > { %s211_s24 = scalar_lea.sflag [#allocation3], %s945_s9  ;;  %s696_s25 = scalar_lea.hbm %s954_s14, 128 }
  0x1a   : > { %p697_p3 = scmp.ne.s32.totalorder %s954_s14, %s696_s25  ;;  %p698_p5 = pneg %p962_p0 }
  0x1b   : > { %s701_s28 = scalar_lea.hbm %s1114_s0, 256  ;;  %p702_p4 = scmp.lt.u32.totalorder %s954_s14, %s1114_s0 }
  0x1c   : > { %p699_p6 = pnand %p698_p5, %p697_p3  ;;  %p703_p10 = scmp.lt.u32.totalorder %s701_s28, %s696_s25 }
  0x1d   : > { %p705_p12 = scmp.lt.u32.totalorder %s696_s25, %s954_s14 }
  0x1e   : > { %p700_p7 = pneg %p699_p6  ;;  %p704_p13 = por %p703_p10, %p702_p4 }
  0x20   : > { %p706_p1 = por %p705_p12, %p704_p13 }
  0x22   : > { %p707_p2 = pnand %p706_p1, %p700_p7 }
  0x24   : > { %710 = shalt.err (!%p707_p2)
}
  0x25   : > { %s711_s15 = scalar_lea.vmem %s958_s16, 128  ;;  %s844_s27 = smov [#allocation2]  }
  0x26   : > { %p712_p3 = scmp.ne.s32.totalorder %s958_s16, %s711_s15  ;;  %s716_s29 = sshll.u32 %s844_s27, 4  ;;  %s717_s29 = int_to_ptr.vmem [resolvable:$false] %s716_s29 }
  0x27   : > { %s718_s12 = scalar_lea.vmem %s717_s29, 256  ;;  %p719_p9 = scmp.lt.s32.totalorder %s958_s16, %s717_s29 }
  0x28   : > { %p714_p6 = pnand %p712_p3, %p698_p5  ;;  %p720_p4 = scmp.lt.s32.totalorder %s718_s12, %s711_s15 }
  0x2a   : > { %p715_p11 = pneg %p714_p6  ;;  %p721_p10 = por %p720_p4, %p719_p9 }
  0x2c   : > { %p722_p12 = pnand %p721_p10, %p715_p11 }
  0x2e   : > { %725 = shalt.err (!%p722_p12)
}
  0x2f   : > { %630 = dma.hbm_to_vmem [thread:$0]  (!%p962_p0), %s954_s14, 128, %s958_s16, %s211_s24  }
  0x30   : > { %p1127_p1 = scmp.lt.s32.totalorder %s842_s23, 3  ;;  %p1128_p2 = scmp.ge.s32.totalorder %s842_s23, 1 }
  0x31   : > { %s1007_s15 = scalar_lea.hbm %s1115_s1, %s594_s11  ;;  %s234_s27 = scalar_lea.vmem [#allocation5], %s593_s10 }
  0x32   : > { %p998_p7 = pnand %p1128_p2, %p1127_p1  ;;  %s243_s29 = sshll.u32 %s234_s27, 4  ;;  %s244_s29 = int_to_ptr.vmem [resolvable:$true] %s243_s29 }
  0x33   : > { %s231_s14 = scalar_lea.sflag [#allocation6], %s945_s9  ;;  %s726_s16 = scalar_lea.hbm %s1007_s15, 128 }
  0x34   : > { %s1129_s25 = scalar_select %p998_p7, 1, 0 }
  0x35   : > { %p727_p9 = scmp.ne.s32.totalorder %s1007_s15, %s726_s16  ;;  %s731_s11 = scalar_lea.hbm %s1115_s1, 256 }
  0x36   : > { %p732_p3 = scmp.lt.u32.totalorder %s1007_s15, %s1115_s1  ;;  %p733_p6 = scmp.lt.u32.totalorder %s731_s11, %s726_s16 }
  0x37   : > { %p729_p11 = pnand %p727_p9, %p698_p5  ;;  %p735_p10 = scmp.lt.u32.totalorder %s726_s16, %s1007_s15 }
  0x38   : > { %p734_p4 = por %p733_p6, %p732_p3 }
  0x39   : > { %p730_p13 = pneg %p729_p11 }
  0x3a   : > { %p736_p12 = por %p735_p10, %p734_p4 }
  0x3c   : > { %p737_p1 = pnand %p736_p12, %p730_p13 }
  0x3e   : > { %740 = shalt.err (!%p737_p1)
}
  0x3f   : > { %s741_s9 = scalar_lea.vmem %s244_s29, 128  ;;  %s845_s10 = smov [#allocation5]  }
  0x40   : > { %p742_p2 = scmp.ne.s32.totalorder %s244_s29, %s741_s9  ;;  %s746_s27 = sshll.u32 %s845_s10, 4  ;;  %s747_s27 = int_to_ptr.vmem [resolvable:$false] %s746_s27 }
  0x41   : > { %s748_s24 = scalar_lea.vmem %s747_s27, 256  ;;  %p749_p8 = scmp.lt.s32.totalorder %s244_s29, %s747_s27 }
  0x42   : > { %p744_p9 = pnand %p742_p2, %p698_p5  ;;  %p750_p7 = scmp.lt.s32.totalorder %s748_s24, %s741_s9 }
  0x44   : > { %p745_p11 = pneg %p744_p9  ;;  %p751_p3 = por %p750_p7, %p749_p8 }
  0x46   : > { %p752_p6 = pnand %p751_p3, %p745_p11 }
  0x48   : > { %755 = shalt.err (!%p752_p6)
}
  0x49   : > { %633 = dma.hbm_to_vmem [thread:$0]  (!%p962_p0), %s1007_s15, 128, %s244_s29, %s231_s14  }
  0x4a   : > { %p1130_p13 = scmp.ne.s32.totalorder %s1129_s25, 0 }
  0x4b   : > { %s1034_s16 = sand.u32 (!%p1130_p13), 1, %s826_s19   ;;  %p1131_p8 = scmp.ne.s32.totalorder (!%p1130_p13), %s1123_s30, 0 }
  0x4c   : > { %252 = sbr.rel (%p1130_p13) target bundleno = 353 (0x161), region = 40  ;;  %s1037_s12 = sshll.u32 (!%p1130_p13), %s1034_s16, 3 }
  0x4d   : > { %s255_s11 = scalar_lea.sflag (!%p1130_p13), [#allocation3], %s1034_s16  ;;  %s258_s28 = scalar_lea.vmem (!%p1130_p13), [#allocation2], %s1037_s12 }
  0x53   : > { %809 = dma.done.wait (%p1131_p8), %s255_s11, 128  }
  0x54   : > { %811 = vsyncadd (%p1131_p8), %s255_s11, 4294967168  ;;  %s264_s17 = scalar_lea.sflag [#allocation6], %s1034_s16  ;;  %s267_s25 = scalar_lea.vmem [#allocation5], %s1037_s12 }
  0x55   : > { %813 = dma.done.wait (%p1131_p8), %s264_s17, 128  }
  0x56   : > { %815 = vsyncadd (%p1131_p8), %s264_s17, 4294967168  ;;  %v846_v0 = vmov 0.0   ;;  %vm847_vm0 = vmmov 0   ;;  %v848_v1 = vmov 0   ;;  %vm303_vm1 = vcmask 64512   ;;  %v300_v2 = vld [vmem:[%s267_s25] sm:$0xff] }
  0x57   : > { %611 = vmatprep.subr.mxu0 %v846_v0  ;;  %616 = vmatprep.subr.mxu1 %v846_v0  ;;  %v299_v3 = vld [vmem:[%s258_s28] sm:$0xff]  ;;  %s604_s10 = sshll.u32 %s834_s21, 7  ;;  %s298_s27 = scalar_lea.vmem [#allocation7], %s1037_s12 }
  0x58   : > { %613 = vmatprep.mubr.msk.f32.mxu0 %vm847_vm0, %v846_v0  ;;  %618 = vmatprep.mubr.msk.f32.mxu1 %vm847_vm0, %v846_v0  ;;  %v302_v4 = vld [vmem:[%s1117_s3] sm:$0xff]  ;;  %v462_v18 = vsub.f32 %v299_v3, %v300_v2  ;;  %s482_s24 = sshll.u32 %s298_s27, 4  ;;  %s1065_s17 = scalar_lea.hbm %s1119_s5, %s604_s10  ;;  %s1067_s24 = int_to_ptr.vmem [resolvable:$true] %s482_s24 }
  0x59   : > { %691 = vset.pattern.permute.xlu0 %v848_v1  ;;  %612 = vmatpush3.msra.mxu0 %v300_v2  ;;  %v301_v5 = vld [vmem:[%s1116_s2] sm:$0xff]  ;;  %s467_s25 = scalar_lea.sflag [#allocation4], %s1034_s16  ;;  %s756_s15 = scalar_lea.vmem %s1067_s24, 128 }
  0x5a   : > { %617 = vmatpush3.msra.mxu1 %v299_v3  ;;  %v450_v6 = vld [vmem:[%s1118_s4] sm:$0xff]  ;;  %614 = vmatmul.mubr.msk.f32.vlgmr.msra.gmra.mrb[0].mxu0 %vm303_vm1, %v302_v4  ;;  %p757_p0 = scmp.ne.s32.totalorder %s1067_s24, %s756_s15  ;;  %p1132_p5 = scmp.ne.s32.totalorder %s1124_s6, 0 }
  0x5b   : > { %619 = vmatmul.mubr.msk.f32.vlgmr.msra.gmra.mrb[0].mxu1 %vm303_vm1, %v301_v5  ;;  %453 = vperm.xlu0 %691, %v450_v6   ;;  %s849_s21 = smov [#allocation7]  }
  0x5c   : > { %p758_p7 = pnand %p757_p0, %p1132_p5  ;;  %s760_s12 = sshll.u32 %s849_s21, 4  ;;  %s761_s12 = int_to_ptr.vmem [resolvable:$false] %s760_s12 }
  0x5d   : > { %s762_s29 = scalar_lea.vmem %s761_s12, 256  ;;  %p763_p10 = scmp.lt.s32.totalorder %s1067_s24, %s761_s12 }
  0x5e   : > { %p759_p4 = pneg %p758_p7  ;;  %p764_p12 = scmp.lt.s32.totalorder %s762_s29, %s756_s15 }
  0x60   : > { %p765_p1 = por %p764_p12, %p763_p10 }
  0x62   : > { %p766_p2 = pnand %p765_p1, %p759_p4 }
  0xda   : > { %v454_v7 = vpop.permute.xlu0 %453 }
 0x12d   : > { %v373_v8 = vpop.f32.mrb[0].mxu0 }
 0x12e   : > { %v446_v9 = vpop.f32.mrb[0].mxu1  ;;  %v615_v11 = vpop.f32.mrb[1].mxu0 }
 0x12f   : > { %v447_v10 = vadd.f32 %v446_v9, %v373_v8  ;;  %v620_v12 = vpop.f32.mrb[1].mxu1 }
 0x131   : > { %v456_v13 = vadd.f32 %v454_v7, %v447_v10 }
 0x133   : > { %v457_v14 = vmin.f32 %v456_v13, 80.0 }
 0x135   : > { %v458_v15 = vmul.f32 1.442695, %v457_v14 }
 0x137   : > { %692 = vpow2.f32 %v458_v15 }
 0x141   : > { %v693_v16 = vpop.eup %692 }
 0x142   : > { %v460_v17 = vadd.f32 1.0, %v693_v16 }
 0x144   : > { %694 = vrcp.f32 %v460_v17 }
 0x14e   : > { %v695_v19 = vpop.eup %694 }
 0x14f   : > { %v463_v20 = vmul.f32 %v695_v19, %v462_v18 }
 0x151   : > { %v464_v21 = vadd.f32 %v463_v20, %v300_v2 }
 0x153   : > { %465 = vst [vmem:[%s298_s27] sm:$0xff] %v464_v21 }
 0x154   : > { %769 = shalt.err (!%p766_p2)
}
 0x155   : > { %s770_s16 = scalar_lea.hbm %s1065_s17, 128  ;;  %s774_s13 = scalar_lea.hbm %s1119_s5, 256 }
 0x156   : > { %p771_p9 = scmp.ne.s32.totalorder %s1065_s17, %s770_s16  ;;  %p775_p6 = scmp.lt.u32.totalorder %s1065_s17, %s1119_s5 }
 0x157   : > { %p776_p13 = scmp.lt.u32.totalorder %s774_s13, %s770_s16  ;;  %p778_p0 = scmp.lt.u32.totalorder %s770_s16, %s1065_s17 }
 0x158   : > { %p772_p11 = pnand %p771_p9, %p1132_p5 }
 0x159   : > { %p777_p8 = por %p776_p13, %p775_p6 }
 0x15a   : > { %p773_p3 = pneg %p772_p11 }
 0x15b   : > { %p779_p7 = por %p778_p0, %p777_p8 }
 0x15d   : > { %p780_p4 = pnand %p779_p7, %p773_p3 }
 0x15f   : > { %783 = shalt.err (!%p780_p4)
}
 0x160   : > { %625 = dma.vmem_to_hbm [thread:$0]  (%p1132_p5), %s1067_s24, 128, %s1065_s17, %s467_s25  }
 0x161 PF: > { %s494_s27 = sand.u32 1, %s822_s18   ;;  %p1133_p10 = scmp.ne.s32.totalorder %s1125_s8, 0 }
 0x162   : > { %p1134_p12 = scmp.ge.s32.totalorder %s842_s23, 2  ;;  %s495_s11 = scalar_lea.sflag [#allocation4], %s494_s27 }
 0x164   : > { %p635_p1 = pnand %p1134_p12, %p1133_p10 }
 0x166   : > { %817 = dma.done.wait (!%p635_p1), %s495_s11, 128  }
 0x167   : > { %819 = vsyncadd (!%p635_p1), %s495_s11, 4294967168  ;;  %s24_s23 = sadd.s32 1, %s842_s23   ;;  %s1135_s18 = smov %s826_s19 }
 0x168   : > { %p21_p2 = scmp.ge.s32.totalorder %s24_s23, 4   ;;  %s1136_s19 = smov %s830_s20 }
 0x169   : > { %s1137_s20 = smov %s936_s7  ;;  %s1138_s21 = smov %s838_s22 }
 0x16a   : > { %s1139_s22 = smov %s1141_s26  ;;  %23 = sbr.rel (!%p21_p2) target bundleno = 8 (0x8), region = 98 }
 0x171   :  { %500 = vsyncpa [#allocation3], 1 }
 0x172   :  { %502 = vsyncpa [#allocation3 + $0x1], 1 }
 0x173   :  { %503 = vsyncpa [#allocation6], 1 }
 0x174   :  { %505 = vsyncpa [#allocation6 + $0x1], 1 }
 0x175   :  { %506 = vsyncpa [#allocation4], 1 }
 0x176   :  { %508 = vsyncpa [#allocation4 + $0x1], 1 }

</bundles_post_ra>
